<compile_context>
chip_gen: v7x
topology: tpu7x:2x2x1
jax: 0.10.0
libtpu: 0.0.40
codegen_flags: <defaults>
</compile_context>

<pallas_src>
import functools

import jax
import jax.numpy as jnp
from jax.experimental import pallas as pl
from jax.experimental.pallas import tpu as pltpu


def _round_up(x, m):
    return ((x + m - 1) // m) * m


def _avgpool_kernel(x_ref, o_ref, acc_ref, *, hw, tk, nk, inv_hw):
    """Streaming mean over the HW axis.

    x_ref  : (TM, TK) input tile in the native dtype. Tail blocks may contain
             undefined lanes/rows past the true array extents: lanes are masked
             below, undefined rows only reach output rows the writeback clips.
    o_ref  : (TM, 1) output tile, resident across the k (reduction) grid axis.
    acc_ref: (TM, 128) float32 accumulator scratch.
    """
    k = pl.program_id(1)
    tm = acc_ref.shape[0]

    @pl.when(k == 0)
    def _init():
        acc_ref[...] = jnp.zeros_like(acc_ref)

    tail_valid = hw - (nk - 1) * tk  # static: valid lanes in the last k block

    def _accumulate(valid_cols):
        # Fold TK lanes down to 128 lanes with pure VPU adds; per-chunk upcast
        # keeps the live set small for sub-32-bit dtypes. Two accumulators keep
        # the add chain short. The single cross-lane (XLU) reduce is deferred to
        # the final reduction step.
        acc0 = jnp.zeros((tm, 128), jnp.float32)
        acc1 = jnp.zeros((tm, 128), jnp.float32)
        for j in range(pl.cdiv(valid_cols, 128)):
            c0 = j * 128
            chunk = x_ref[:, c0:c0 + 128].astype(jnp.float32)
            if c0 + 128 > valid_cols:  # static check: ragged tail chunk only
                lane = jax.lax.broadcasted_iota(jnp.int32, (tm, 128), 1)
                chunk = jnp.where(lane < (valid_cols - c0), chunk, 0.0)
            if j % 2 == 0:
                acc0 = acc0 + chunk
            else:
                acc1 = acc1 + chunk
        acc_ref[...] += acc0 + acc1

    if tail_valid == tk:
        # hw is a multiple of tk: every block is fully valid, zero mask overhead.
        _accumulate(tk)
    else:
        @pl.when(k < nk - 1)
        def _full_blocks():
            _accumulate(tk)

        @pl.when(k == nk - 1)
        def _tail_block():
            _accumulate(tail_valid)

    @pl.when(k == nk - 1)
    def _finalize():
        row_sum = jnp.sum(acc_ref[...], axis=-1, keepdims=True)  # (TM, 1), XLU once
        o_ref[...] = (row_sum * inv_hw).astype(o_ref.dtype)


def avg_pool(x, *, block_bytes_target=8 << 20, tm_cap=512, seg_bytes_cap=1 << 16):
    """Pallas equivalent of x.reshape(N, C, -1).mean(dim=-1)."""
    n, c = x.shape[0], x.shape[1]
    x_flat = x.reshape(n * c, -1)  # native dtype straight into the DMA (no pre-upcast)
    nc, hw = x_flat.shape
    itemsize = jnp.dtype(x_flat.dtype).itemsize
    sub = max(8, 32 // itemsize)  # packed sublane multiple: 8 f32, 16 bf16, 32 int8

    # Reduction tile: as wide as possible (long contiguous HBM segments, up to
    # seg_bytes_cap per row), lanes a multiple of 128. The cdiv grid + in-kernel
    # masking removes any need for jnp.pad.
    tk = min(_round_up(hw, 128), max(128, (seg_bytes_cap // itemsize) // 128 * 128))

    # Row tile: sized so one input block is ~block_bytes_target bytes in any dtype.
    tm = max(sub, (block_bytes_target // (tk * itemsize)) // sub * sub)
    tm = min(tm, tm_cap, _round_up(nc, sub))
    # v7x has 2 TensorCores: keep >= 2 blocks on the "parallel" row axis whenever
    # there is enough work to split (no-op on single-TC v5e/v6e).
    if pl.cdiv(nc, tm) < 2 and nc > 2 * sub:
        tm = _round_up(pl.cdiv(nc, 2), sub)

    grid = (pl.cdiv(nc, tm), pl.cdiv(hw, tk))  # rows parallel, HW reduction last

    # 2 double-buffered input blocks + f32 accumulator scratch + slack; capped so it
    # also fits v7x's 64 MiB physical VMEM.  TODO(synk): sweep pl.Buffered(3) on the
    # input spec for v7x once per-generation tile tables are measured.
    block_bytes = tm * tk * itemsize
    vmem_limit = min(48 << 20,
                     max(32 << 20, 2 * block_bytes + tm * 128 * 4 + (2 << 20)))

    out = pl.pallas_call(
        functools.partial(_avgpool_kernel, hw=hw, tk=tk, nk=grid[1], inv_hw=1.0 / hw),
        out_shape=jax.ShapeDtypeStruct((nc, 1), x.dtype),
        grid=grid,
        in_specs=[pl.BlockSpec((tm, tk), lambda i, k: (i, k))],
        out_specs=pl.BlockSpec((tm, 1), lambda i, k: (i, 0)),  # resident across k
        scratch_shapes=[pltpu.VMEM((tm, 128), jnp.float32)],
        compiler_params=pltpu.CompilerParams(
            dimension_semantics=("parallel", "arbitrary"),
            vmem_limit_bytes=vmem_limit),
    )(x_flat)

    return out.reshape(n, c)


if __name__ == "__main__":
    key = jax.random.PRNGKey(0)
    x = jax.random.normal(key, (2, 4, 16, 16), dtype=jnp.float32)

    y = jax.block_until_ready(avg_pool(x))

    # correctness check against plain-JAX reference
    ref = x.reshape(x.shape[0], x.shape[1], -1).mean(axis=-1)
    assert y.shape == (2, 4), y.shape
    assert jnp.allclose(y, ref, atol=1e-5, rtol=1e-5)

    # also exercise a non-tile-multiple shape (ragged HW and rows) on the same kernel
    x2 = jax.random.normal(jax.random.PRNGKey(1), (3, 5, 7, 7), dtype=jnp.float32)
    y2 = jax.block_until_ready(avg_pool(x2))
    ref2 = x2.reshape(3, 5, -1).mean(axis=-1)
    assert jnp.allclose(y2, ref2, atol=1e-5, rtol=1e-5)

    print("KERNEL_OK")
</pallas_src>

<mosaic_0001>
module attributes {stable_mosaic.version = 11 : i64} {
  func.func @_avgpool_kernel(%arg0: i32, %arg1: i32, %arg2: memref<8x256xf32, #tpu.memory_space<vmem>>, %arg3: memref<8x1xf32, #tpu.memory_space<vmem>>, %arg4: memref<8x128xf32, #tpu.memory_space<vmem>>) attributes {dimension_semantics = [#tpu.dimension_semantics<parallel>, #tpu.dimension_semantics<arbitrary>], iteration_bounds = array<i64: 1, 1>, scalar_prefetch = 0 : i64, scratch_operands = 1 : i64, tpu.core_type = #tpu.core_type<tc>, window_params = [{transform_indices = @transform_0, window_bounds = array<i64: 8, 256>}, {transform_indices = @transform_1, window_bounds = array<i64: 8, 1>}]} {
    %c0_i32 = arith.constant 0 : i32
    %0 = arith.cmpi eq, %arg1, %c0_i32 : i32
    %1 = arith.extui %0 : i1 to i32
    %c0_i32_0 = arith.constant 0 : i32
    %2 = arith.cmpi ne, %1, %c0_i32_0 : i32
    scf.if %2 {
      %cst_10 = arith.constant 0.000000e+00 : f32
      %16 = vector.broadcast %cst_10 : f32 to vector<8x128xf32>
      %c0_11 = arith.constant 0 : index
      %c0_12 = arith.constant 0 : index
      %17 = vector.load %arg4[%c0_11, %c0_12] : memref<8x128xf32, #tpu.memory_space<vmem>>, vector<8x128xf32>
      tpu.vector_store %arg4[%c0_11, %c0_12], %16 {strides = array<i32>} : memref<8x128xf32, #tpu.memory_space<vmem>>, vector<8x128xf32>,
    } else {
    }
    %cst = arith.constant 0.000000e+00 : f32
    %3 = vector.broadcast %cst : f32 to vector<8x128xf32>
    %cst_1 = arith.constant 0.000000e+00 : f32
    %4 = vector.broadcast %cst_1 : f32 to vector<8x128xf32>
    %c0 = arith.constant 0 : index
    %c0_2 = arith.constant 0 : index
    %5 = vector.load %arg2[%c0, %c0_2] : memref<8x256xf32, #tpu.memory_space<vmem>>, vector<8x128xf32>
    %6 = arith.addf %3, %5 : vector<8x128xf32>
    %c0_3 = arith.constant 0 : index
    %c128 = arith.constant 128 : index
    %7 = vector.load %arg2[%c0_3, %c128] : memref<8x256xf32, #tpu.memory_space<vmem>>, vector<8x128xf32>
    %8 = arith.addf %4, %7 : vector<8x128xf32>
    %c0_4 = arith.constant 0 : index
    %c0_5 = arith.constant 0 : index
    %9 = vector.load %arg4[%c0_4, %c0_5] : memref<8x128xf32, #tpu.memory_space<vmem>>, vector<8x128xf32>
    %10 = arith.addf %6, %8 : vector<8x128xf32>
    %11 = arith.addf %9, %10 : vector<8x128xf32>
    %c0_6 = arith.constant 0 : index
    %c0_7 = arith.constant 0 : index
    %12 = vector.load %arg4[%c0_6, %c0_7] : memref<8x128xf32, #tpu.memory_space<vmem>>, vector<8x128xf32>
    tpu.vector_store %arg4[%c0_6, %c0_7], %11 {strides = array<i32>} : memref<8x128xf32, #tpu.memory_space<vmem>>, vector<8x128xf32>,
    %c0_i32_8 = arith.constant 0 : i32
    %13 = arith.cmpi eq, %arg1, %c0_i32_8 : i32
    %14 = arith.extui %13 : i1 to i32
    %c0_i32_9 = arith.constant 0 : i32
    %15 = arith.cmpi ne, %14, %c0_i32_9 : i32
    scf.if %15 {
      %c0_10 = arith.constant 0 : index
      %c0_11 = arith.constant 0 : index
      %16 = vector.load %arg4[%c0_10, %c0_11] : memref<8x128xf32, #tpu.memory_space<vmem>>, vector<8x128xf32>
      %cst_12 = arith.constant dense<0.000000e+00> : vector<8xf32>
      %17 = vector.multi_reduction <add>, %16, %cst_12 [1] : vector<8x128xf32> to vector<8xf32>
      %18 = vector.shape_cast %17 : vector<8xf32> to vector<8x1xf32>
      %cst_13 = arith.constant 3.906250e-03 : f32
      %19 = vector.broadcast %cst_13 : f32 to vector<8x1xf32>
      %20 = arith.mulf %18, %19 : vector<8x1xf32>
      %c0_14 = arith.constant 0 : index
      %c0_15 = arith.constant 0 : index
      %21 = vector.load %arg3[%c0_14, %c0_15] : memref<8x1xf32, #tpu.memory_space<vmem>>, vector<8x1xf32>
      tpu.vector_store %arg3[%c0_14, %c0_15], %20 {strides = array<i32>} : memref<8x1xf32, #tpu.memory_space<vmem>>, vector<8x1xf32>,
    } else {
    }
    return
  }
  func.func @transform_0(%arg0: i32, %arg1: i32) -> (i32, i32) {
    %c0_i32 = arith.constant 0 : i32
    return %arg0, %arg1 : i32, i32
  }
  func.func @transform_1(%arg0: i32, %arg1: i32) -> (i32, i32) {
    %c0_i32 = arith.constant 0 : i32
    %c0_i32_0 = arith.constant 0 : i32
    return %arg0, %c0_i32 : i32, i32
  }
}

</mosaic_0001>

<bundles_post_ra>
// kernel: tpu_custom_call.1
= control target key start
LH: loop header
LB: loop body
LE: loop exit
PB: predicated region body
PF: predicated region fallthrough
CT: control target
= control target key end

     0   :  { %6 = vsyncpa [#allocation4], 0  ;;  %s72_s6 = smov [#allocation3]   ;;  %s98_s0 = inlined_call_operand.hbm [shape: f32[8,256], index: 0, kind: input, shape index: {}]   ;;  %s99_s1 = inlined_call_operand.vmem [shape: f32[8,1], index: 1, kind: output, shape index: {}]  }
   0x1   :  { %s13_s7 = sshll.u32 %s72_s6, 4  ;;  %s48_s10 = scalar_lea.hbm %s98_s0, 256  ;;  %s14_s7 = int_to_ptr.vmem [resolvable:$true] %s13_s7 }
   0x2   :  { %p49_p0 = scmp.ne.s32.totalorder %s98_s0, %s48_s10  ;;  %p52_p1 = scmp.lt.u32.totalorder %s48_s10, %s98_s0 }
   0x4   :  { %p54_p2 = pnand %p52_p1, %p49_p0 }
   0x6   :  { %57 = shalt.err (!%p54_p2)
}
   0x7   :  { %s58_s15 = scalar_lea.vmem %s14_s7, 256  ;;  %p63_p4 = scmp.lt.s32.totalorder %s14_s7, %s14_s7 }
   0x8   :  { %p59_p3 = scmp.ne.s32.totalorder %s14_s7, %s58_s15  ;;  %p64_p5 = scmp.lt.s32.totalorder %s58_s15, %s58_s15 }
   0xa   :  { %p65_p6 = por %p64_p5, %p63_p4 }
   0xc   :  { %p66_p7 = pnand %p65_p6, %p59_p3 }
   0xe   :  { %69 = shalt.err (!%p66_p7)
}
   0xf   :  { %16 = dma.hbm_to_vmem [thread:$0]  %s98_s0, 256, %s14_s7, [#allocation4]  }
  0x10   :  { %70 = dma.done.wait [#allocation4], 256  }
  0x11   :  { %71 = vsyncadd [#allocation4], 4294967040  ;;  %v25_v0 = vld [vmem:[#allocation3] sm:$0xff]  ;;  %v27_v1 = vld [vmem:[#allocation3 + $0x8] sm:$0xff]  ;;  %vm40_vm0 = vcmask 7168  }
  0x12   :  { %v30_v2 = vadd.f32 %v27_v1, %v25_v0 }
  0x14   :  { %37 = vadd.xlane.f32.xlu0 %v30_v2 }
  0xa1   :  { %v38_v3 = vpop.xlane.xlu0 %37 }
  0xa2   :  { %v39_v4 = vmul.f32 0.00390625, %v38_v3 }
  0xa4   :  { %41 = vst.msk [vmem:[%s99_s1] sm:$0xff] %vm40_vm0, %v39_v4 }
  0xa5   :  { %46 = vsyncpa [#allocation4], 1 }

</bundles_post_ra>
